<compile_context>
chip_gen: v5e
topology: v5e:2x2
jax: 0.10.0
libtpu: 0.0.40
codegen_flags: <defaults>
</compile_context>

<pallas_src>
import math

import jax
import jax.numpy as jnp
from jax import lax
from jax.experimental import pallas as pl
from jax.experimental.pallas import tpu as pltpu

# ---- config (GPTConfig equivalent, small) -----------------------------------
B, T, C, H = 2, 8, 32, 4          # batch, seq, n_embed, n_head
D = C // H                        # head_dim
DH = D // 2
ROT_BASE = 10000.0
SCALE = 1.0 / math.sqrt(D)
# dropout = 0.0 (eval) -> resid_dropout / sdpa dropout are identities.
# bias = True for both linears, use_rotary = True, causal sdpa.


# ---- fused kernel: one (T, C) batch tile per grid step -----------------------
def _fused_attn_kernel(x_ref, wqkv_ref, bqkv_ref, wproj_ref, bproj_ref,
                       cos_ref, sin_ref, o_ref):
    # x_ref: (T, C) rows of batch b.  Weights/tables are whole (constant blocks).
    x = x_ref[...]

    # c_attn: (T, C) @ (C, 3C) + (1, 3C)
    qkv = (jnp.dot(x, wqkv_ref[...], preferred_element_type=jnp.float32)
           + bqkv_ref[...])                                    # (T, 3C) f32

    rows = lax.broadcasted_iota(jnp.int32, (T, T), 0)
    cols = lax.broadcasted_iota(jnp.int32, (T, T), 1)
    causal = rows >= cols

    head_out = []
    for h in range(H):                                          # static unroll (H=4)
        q = qkv[:, h * D:(h + 1) * D]                           # (T, D) lane slices,
        k = qkv[:, C + h * D:C + (h + 1) * D]                   # no transposes needed
        v = qkv[:, 2 * C + h * D:2 * C + (h + 1) * D]

        cos = cos_ref[h:h + 1, :]                               # (1, D) = [cos, cos]
        sin = sin_ref[h:h + 1, :]                               # (1, D) = [sin, -sin]

        def rot(t):
            # rotate-half with folded signed tables:
            #   [t1, t2]*[c,c] + [t2, t1]*[s,-s] = [t1*c + t2*s, -t1*s + t2*c]
            swapped = jnp.concatenate([t[:, DH:], t[:, :DH]], axis=-1)
            return t * cos + swapped * sin

        q = rot(q) * SCALE                                      # fold 1/sqrt(D) into q
        k = rot(k)

        s = jnp.dot(q, k.T, preferred_element_type=jnp.float32)  # (T, T)
        s = jnp.where(causal, s, -jnp.inf)
        s = s - jnp.max(s, axis=-1, keepdims=True)
        p = jnp.exp(s)
        inv_l = pl.reciprocal(jnp.sum(p, axis=-1, keepdims=True), approx=True)
        head_out.append(jnp.dot(p, v, preferred_element_type=jnp.float32) * inv_l)

    y = jnp.concatenate(head_out, axis=-1)                      # (T, C), lane-dense

    # c_proj: (T, C) @ (C, C) + (1, C); resid_dropout(p=0) is identity.
    o_ref[...] = (jnp.dot(y, wproj_ref[...], preferred_element_type=jnp.float32)
                  + bproj_ref[...]).astype(o_ref.dtype)


def causal_self_attention(x, w_qkv, b_qkv, w_proj, b_proj, cos_full, sin_signed):
    Bx, Tx, Cx = x.shape
    x2d = x.reshape(Bx * Tx, Cx)                                # free reshape in XLA
    out2d = pl.pallas_call(
        _fused_attn_kernel,
        out_shape=jax.ShapeDtypeStruct((Bx * Tx, Cx), x.dtype),
        grid=(Bx,),
        in_specs=[
            pl.BlockSpec((Tx, Cx), lambda b: (b, 0)),           # x rows of batch b
            pl.BlockSpec((Cx, 3 * Cx), lambda b: (0, 0)),       # c_attn weight (constant block)
            pl.BlockSpec((1, 3 * Cx), lambda b: (0, 0)),        # c_attn bias
            pl.BlockSpec((Cx, Cx), lambda b: (0, 0)),           # c_proj weight
            pl.BlockSpec((1, Cx), lambda b: (0, 0)),            # c_proj bias
            pl.BlockSpec((H, D), lambda b: (0, 0)),             # folded cos table
            pl.BlockSpec((H, D), lambda b: (0, 0)),             # folded signed sin table
        ],
        out_specs=pl.BlockSpec((Tx, Cx), lambda b: (b, 0)),
        compiler_params=pltpu.CompilerParams(
            dimension_semantics=("parallel",)),                 # v7x: 2 TCs, one batch each
    )(x2d, w_qkv, b_qkv, w_proj, b_proj, cos_full, sin_signed)
    return out2d.reshape(Bx, Tx, Cx)


# ---- rotary tables (head-indexed, reproducing the module's quirk) ------------
def rotary_tables(n_pos, dim, base=ROT_BASE):
    # Reference computes base ** int-arange (int64, overflow-prone); use float32.
    inv_freq = 1.0 / (base ** jnp.arange(0, dim, 2, dtype=jnp.float32))
    t = jnp.arange(n_pos, dtype=jnp.float32)
    freqs = jnp.outer(t, inv_freq)                              # (n_pos, dim//2)
    return jnp.cos(freqs), jnp.sin(freqs)


def folded_rotary_tables(n_pos, dim, base=ROT_BASE):
    cos, sin = rotary_tables(n_pos, dim, base)
    cos_full = jnp.concatenate([cos, cos], axis=-1)             # (n_pos, dim)
    sin_signed = jnp.concatenate([sin, -sin], axis=-1)          # (n_pos, dim)
    return cos_full, sin_signed


# ---- pure-JAX reference for verification -------------------------------------
def reference(x, w_qkv, b_qkv, w_proj, b_proj):
    qkv = x @ w_qkv + b_qkv[0]
    q, k, v = jnp.split(qkv, 3, axis=2)
    q = q.reshape(B, T, H, D).transpose(0, 2, 1, 3)
    k = k.reshape(B, T, H, D).transpose(0, 2, 1, 3)
    v = v.reshape(B, T, H, D).transpose(0, 2, 1, 3)
    cos, sin = rotary_tables(q.shape[1], D)       # q.shape[1] == n_head (module quirk)
    cb, sb = cos[None, :, None, :], sin[None, :, None, :]
    d = D // 2

    def rot(xx):
        x1, x2 = xx[..., :d], xx[..., d:]
        return jnp.concatenate([x1 * cb + x2 * sb, -x1 * sb + x2 * cb], axis=-1)

    q, k = rot(q), rot(k)
    s = (q @ jnp.swapaxes(k, -1, -2)) * (1.0 / math.sqrt(D))
    mask = jnp.tril(jnp.ones((T, T), dtype=bool))
    s = jnp.where(mask, s, -jnp.inf)
    a = jax.nn.softmax(s, axis=-1)
    y = (a @ v).transpose(0, 2, 1, 3).reshape(B, T, C)
    return y @ w_proj + b_proj[0]


if __name__ == "__main__":
    key = jax.random.PRNGKey(0)
    ks = jax.random.split(key, 5)
    x = jax.random.normal(ks[0], (B, T, C), jnp.float32)
    w_qkv = jax.random.normal(ks[1], (C, 3 * C), jnp.float32) * 0.02   # c_attn weight^T
    b_qkv = jax.random.normal(ks[2], (1, 3 * C), jnp.float32) * 0.02   # c_attn bias
    w_proj = jax.random.normal(ks[3], (C, C), jnp.float32) * 0.02      # c_proj weight^T
    b_proj = jax.random.normal(ks[4], (1, C), jnp.float32) * 0.02      # c_proj bias

    cos_full, sin_signed = folded_rotary_tables(H, D)   # seq_len_cached == n_head

    y = causal_self_attention(x, w_qkv, b_qkv, w_proj, b_proj, cos_full, sin_signed)
    jax.block_until_ready(y)

    y_ref = reference(x, w_qkv, b_qkv, w_proj, b_proj)
    # Slightly loosened tolerance to accommodate pl.reciprocal(approx=True) in softmax.
    assert jnp.allclose(y, y_ref, atol=2e-3, rtol=2e-3), "mismatch vs reference"
    print("KERNEL_OK")
</pallas_src>

<mosaic_0001>
module attributes {stable_mosaic.version = 11 : i64} {
  func.func @_fused_attn_kernel(%arg0: i32, %arg1: memref<8x32xf32, #tpu.memory_space<vmem>>, %arg2: memref<32x96xf32, #tpu.memory_space<vmem>>, %arg3: memref<1x96xf32, #tpu.memory_space<vmem>>, %arg4: memref<32x32xf32, #tpu.memory_space<vmem>>, %arg5: memref<1x32xf32, #tpu.memory_space<vmem>>, %arg6: memref<4x8xf32, #tpu.memory_space<vmem>>, %arg7: memref<4x8xf32, #tpu.memory_space<vmem>>, %arg8: memref<8x32xf32, #tpu.memory_space<vmem>>) attributes {dimension_semantics = [#tpu.dimension_semantics<parallel>], iteration_bounds = array<i64: 2>, scalar_prefetch = 0 : i64, scratch_operands = 0 : i64, tpu.core_type = #tpu.core_type<tc>, window_params = [{transform_indices = @transform_0, window_bounds = array<i64: 8, 32>}, {pipeline_mode = #tpu.pipeline_mode<synchronous>, transform_indices = @transform_1, window_bounds = array<i64: 32, 96>}, {pipeline_mode = #tpu.pipeline_mode<synchronous>, transform_indices = @transform_2, window_bounds = array<i64: 1, 96>}, {pipeline_mode = #tpu.pipeline_mode<synchronous>, transform_indices = @transform_3, window_bounds = array<i64: 32, 32>}, {pipeline_mode = #tpu.pipeline_mode<synchronous>, transform_indices = @transform_4, window_bounds = array<i64: 1, 32>}, {pipeline_mode = #tpu.pipeline_mode<synchronous>, transform_indices = @transform_5, window_bounds = array<i64: 4, 8>}, {pipeline_mode = #tpu.pipeline_mode<synchronous>, transform_indices = @transform_6, window_bounds = array<i64: 4, 8>}, {transform_indices = @transform_7, window_bounds = array<i64: 8, 32>}]} {
    %c0 = arith.constant 0 : index
    %c0_0 = arith.constant 0 : index
    %0 = vector.load %arg1[%c0, %c0_0] : memref<8x32xf32, #tpu.memory_space<vmem>>, vector<8x32xf32>
    %c0_1 = arith.constant 0 : index
    %c0_2 = arith.constant 0 : index
    %1 = vector.load %arg2[%c0_1, %c0_2] : memref<32x96xf32, #tpu.memory_space<vmem>>, vector<32x96xf32>
    %cst = arith.constant dense<0.000000e+00> : vector<8x96xf32>
    %2 = tpu.matmul %0, %1, %cst {dimension_numbers = #tpu.dot_dimension_numbers<[1], [0], [0], [1], [0, 0, 1, 1], [], []>} : vector<8x32xf32>, vector<32x96xf32>, vector<8x96xf32> -> vector<8x96xf32>
    %c0_3 = arith.constant 0 : index
    %c0_4 = arith.constant 0 : index
    %3 = vector.load %arg3[%c0_3, %c0_4] : memref<1x96xf32, #tpu.memory_space<vmem>>, vector<1x96xf32>
    %4 = vector.broadcast %3 : vector<1x96xf32> to vector<8x96xf32>
    %5 = arith.addf %2, %4 : vector<8x96xf32>
    %6 = tpu.iota {dimensions = array<i32: 0>} : vector<8x8xi32>
    %7 = tpu.iota {dimensions = array<i32: 1>} : vector<8x8xi32>
    %8 = arith.cmpi sge, %6, %7 : vector<8x8xi32>
    %9 = vector.extract_strided_slice %5 {offsets = [0, 0], sizes = [8, 8], strides = [1, 1]} : vector<8x96xf32> to vector<8x8xf32>
    %10 = vector.extract_strided_slice %5 {offsets = [0, 32], sizes = [8, 8], strides = [1, 1]} : vector<8x96xf32> to vector<8x8xf32>
    %11 = vector.extract_strided_slice %5 {offsets = [0, 64], sizes = [8, 8], strides = [1, 1]} : vector<8x96xf32> to vector<8x8xf32>
    %c0_5 = arith.constant 0 : index
    %c0_6 = arith.constant 0 : index
    %12 = vector.load %arg6[%c0_5, %c0_6] : memref<4x8xf32, #tpu.memory_space<vmem>>, vector<1x8xf32>
    %c0_7 = arith.constant 0 : index
    %c0_8 = arith.constant 0 : index
    %13 = vector.load %arg7[%c0_7, %c0_8] : memref<4x8xf32, #tpu.memory_space<vmem>>, vector<1x8xf32>
    %14 = vector.extract_strided_slice %9 {offsets = [0, 4], sizes = [8, 4], strides = [1, 1]} : vector<8x8xf32> to vector<8x4xf32>
    %15 = vector.extract_strided_slice %9 {offsets = [0, 0], sizes = [8, 4], strides = [1, 1]} : vector<8x8xf32> to vector<8x4xf32>
    %16 = tpu.concatenate %14, %15 in 1 : vector<8x4xf32>, vector<8x4xf32> -> vector<8x8xf32>
    %17 = vector.broadcast %12 : vector<1x8xf32> to vector<8x8xf32>
    %18 = arith.mulf %9, %17 : vector<8x8xf32>
    %19 = vector.broadcast %13 : vector<1x8xf32> to vector<8x8xf32>
    %20 = arith.mulf %16, %19 : vector<8x8xf32>
    %21 = arith.addf %18, %20 : vector<8x8xf32>
    %cst_9 = arith.constant 0.353553385 : f32
    %22 = vector.broadcast %cst_9 : f32 to vector<8x8xf32>
    %23 = arith.mulf %21, %22 : vector<8x8xf32>
    %24 = vector.extract_strided_slice %10 {offsets = [0, 4], sizes = [8, 4], strides = [1, 1]} : vector<8x8xf32> to vector<8x4xf32>
    %25 = vector.extract_strided_slice %10 {offsets = [0, 0], sizes = [8, 4], strides = [1, 1]} : vector<8x8xf32> to vector<8x4xf32>
    %26 = tpu.concatenate %24, %25 in 1 : vector<8x4xf32>, vector<8x4xf32> -> vector<8x8xf32>
    %27 = vector.broadcast %12 : vector<1x8xf32> to vector<8x8xf32>
    %28 = arith.mulf %10, %27 : vector<8x8xf32>
    %29 = vector.broadcast %13 : vector<1x8xf32> to vector<8x8xf32>
    %30 = arith.mulf %26, %29 : vector<8x8xf32>
    %31 = arith.addf %28, %30 : vector<8x8xf32>
    %32 = tpu.transpose %31, [1, 0] : vector<8x8xf32> -> vector<8x8xf32>
    %cst_10 = arith.constant dense<0.000000e+00> : vector<8x8xf32>
    %33 = tpu.matmul %23, %32, %cst_10 {dimension_numbers = #tpu.dot_dimension_numbers<[1], [0], [0], [1], [0, 0, 1, 1], [], []>} : vector<8x8xf32>, vector<8x8xf32>, vector<8x8xf32> -> vector<8x8xf32>
    %cst_11 = arith.constant 0xFF800000 : f32
    %34 = vector.broadcast %cst_11 : f32 to vector<8x8xf32>
    %35 = arith.select %8, %33, %34 : vector<8x8xi1>, vector<8x8xf32>
    %cst_12 = arith.constant dense<0xFF800000> : vector<8xf32>
    %36 = vector.multi_reduction <maximumf>, %35, %cst_12 [1] : vector<8x8xf32> to vector<8xf32>
    %37 = vector.shape_cast %36 : vector<8xf32> to vector<8x1xf32>
    %38 = vector.broadcast %37 : vector<8x1xf32> to vector<8x8xf32>
    %39 = arith.subf %35, %38 : vector<8x8xf32>
    %40 = math.exp %39 : vector<8x8xf32>
    %cst_13 = arith.constant dense<0.000000e+00> : vector<8xf32>
    %41 = vector.multi_reduction <add>, %40, %cst_13 [1] : vector<8x8xf32> to vector<8xf32>
    %42 = vector.shape_cast %41 : vector<8xf32> to vector<8x1xf32>
    %43 = tpu.reciprocal %42 {approx = true} : vector<8x1xf32> -> vector<8x1xf32>
    %cst_14 = arith.constant dense<0.000000e+00> : vector<8x8xf32>
    %44 = tpu.matmul %40, %11, %cst_14 {dimension_numbers = #tpu.dot_dimension_numbers<[1], [0], [0], [1], [0, 0, 1, 1], [], []>} : vector<8x8xf32>, vector<8x8xf32>, vector<8x8xf32> -> vector<8x8xf32>
    %45 = vector.broadcast %43 : vector<8x1xf32> to vector<8x8xf32>
    %46 = arith.mulf %44, %45 : vector<8x8xf32>
    %47 = vector.extract_strided_slice %5 {offsets = [0, 8], sizes = [8, 8], strides = [1, 1]} : vector<8x96xf32> to vector<8x8xf32>
    %48 = vector.extract_strided_slice %5 {offsets = [0, 40], sizes = [8, 8], strides = [1, 1]} : vector<8x96xf32> to vector<8x8xf32>
    %49 = vector.extract_strided_slice %5 {offsets = [0, 72], sizes = [8, 8], strides = [1, 1]} : vector<8x96xf32> to vector<8x8xf32>
    %c1 = arith.constant 1 : index
    %c0_15 = arith.constant 0 : index
    %50 = vector.load %arg6[%c1, %c0_15] : memref<4x8xf32, #tpu.memory_space<vmem>>, vector<1x8xf32>
    %c1_16 = arith.constant 1 : index
    %c0_17 = arith.constant 0 : index
    %51 = vector.load %arg7[%c1_16, %c0_17] : memref<4x8xf32, #tpu.memory_space<vmem>>, vector<1x8xf32>
    %52 = vector.extract_strided_slice %47 {offsets = [0, 4], sizes = [8, 4], strides = [1, 1]} : vector<8x8xf32> to vector<8x4xf32>
    %53 = vector.extract_strided_slice %47 {offsets = [0, 0], sizes = [8, 4], strides = [1, 1]} : vector<8x8xf32> to vector<8x4xf32>
    %54 = tpu.concatenate %52, %53 in 1 : vector<8x4xf32>, vector<8x4xf32> -> vector<8x8xf32>
    %55 = vector.broadcast %50 : vector<1x8xf32> to vector<8x8xf32>
    %56 = arith.mulf %47, %55 : vector<8x8xf32>
    %57 = vector.broadcast %51 : vector<1x8xf32> to vector<8x8xf32>
    %58 = arith.mulf %54, %57 : vector<8x8xf32>
    %59 = arith.addf %56, %58 : vector<8x8xf32>
    %cst_18 = arith.constant 0.353553385 : f32
    %60 = vector.broadcast %cst_18 : f32 to vector<8x8xf32>
    %61 = arith.mulf %59, %60 : vector<8x8xf32>
    %62 = vector.extract_strided_slice %48 {offsets = [0, 4], sizes = [8, 4], strides = [1, 1]} : vector<8x8xf32> to vector<8x4xf32>
    %63 = vector.extract_strided_slice %48 {offsets = [0, 0], sizes = [8, 4], strides = [1, 1]} : vector<8x8xf32> to vector<8x4xf32>
    %64 = tpu.concatenate %62, %63 in 1 : vector<8x4xf32>, vector<8x4xf32> -> vector<8x8xf32>
    %65 = vector.broadcast %50 : vector<1x8xf32> to vector<8x8xf32>
    %66 = arith.mulf %48, %65 : vector<8x8xf32>
    %67 = vector.broadcast %51 : vector<1x8xf32> to vector<8x8xf32>
    %68 = arith.mulf %64, %67 : vector<8x8xf32>
    %69 = arith.addf %66, %68 : vector<8x8xf32>
    %70 = tpu.transpose %69, [1, 0] : vector<8x8xf32> -> vector<8x8xf32>
    %cst_19 = arith.constant dense<0.000000e+00> : vector<8x8xf32>
    %71 = tpu.matmul %61, %70, %cst_19 {dimension_numbers = #tpu.dot_dimension_numbers<[1], [0], [0], [1], [0, 0, 1, 1], [], []>} : vector<8x8xf32>, vector<8x8xf32>, vector<8x8xf32> -> vector<8x8xf32>
    %cst_20 = arith.constant 0xFF800000 : f32
    %72 = vector.broadcast %cst_20 : f32 to vector<8x8xf32>
    %73 = arith.select %8, %71, %72 : vector<8x8xi1>, vector<8x8xf32>
    %cst_21 = arith.constant dense<0xFF800000> : vector<8xf32>
    %74 = vector.multi_reduction <maximumf>, %73, %cst_21 [1] : vector<8x8xf32> to vector<8xf32>
    %75 = vector.shape_cast %74 : vector<8xf32> to vector<8x1xf32>
    %76 = vector.broadcast %75 : vector<8x1xf32> to vector<8x8xf32>
    %77 = arith.subf %73, %76 : vector<8x8xf32>
    %78 = math.exp %77 : vector<8x8xf32>
    %cst_22 = arith.constant dense<0.000000e+00> : vector<8xf32>
    %79 = vector.multi_reduction <add>, %78, %cst_22 [1] : vector<8x8xf32> to vector<8xf32>
    %80 = vector.shape_cast %79 : vector<8xf32> to vector<8x1xf32>
    %81 = tpu.reciprocal %80 {approx = true} : vector<8x1xf32> -> vector<8x1xf32>
    %cst_23 = arith.constant dense<0.000000e+00> : vector<8x8xf32>
    %82 = tpu.matmul %78, %49, %cst_23 {dimension_numbers = #tpu.dot_dimension_numbers<[1], [0], [0], [1], [0, 0, 1, 1], [], []>} : vector<8x8xf32>, vector<8x8xf32>, vector<8x8xf32> -> vector<8x8xf32>
    %83 = vector.broadcast %81 : vector<8x1xf32> to vector<8x8xf32>
    %84 = arith.mulf %82, %83 : vector<8x8xf32>
    %85 = vector.extract_strided_slice %5 {offsets = [0, 16], sizes = [8, 8], strides = [1, 1]} : vector<8x96xf32> to vector<8x8xf32>
    %86 = vector.extract_strided_slice %5 {offsets = [0, 48], sizes = [8, 8], strides = [1, 1]} : vector<8x96xf32> to vector<8x8xf32>
    %87 = vector.extract_strided_slice %5 {offsets = [0, 80], sizes = [8, 8], strides = [1, 1]} : vector<8x96xf32> to vector<8x8xf32>
    %c2 = arith.constant 2 : index
    %c0_24 = arith.constant 0 : index
    %88 = vector.load %arg6[%c2, %c0_24] : memref<4x8xf32, #tpu.memory_space<vmem>>, vector<1x8xf32>
    %c2_25 = arith.constant 2 : index
    %c0_26 = arith.constant 0 : index
    %89 = vector.load %arg7[%c2_25, %c0_26] : memref<4x8xf32, #tpu.memory_space<vmem>>, vector<1x8xf32>
    %90 = vector.extract_strided_slice %85 {offsets = [0, 4], sizes = [8, 4], strides = [1, 1]} : vector<8x8xf32> to vector<8x4xf32>
    %91 = vector.extract_strided_slice %85 {offsets = [0, 0], sizes = [8, 4], strides = [1, 1]} : vector<8x8xf32> to vector<8x4xf32>
    %92 = tpu.concatenate %90, %91 in 1 : vector<8x4xf32>, vector<8x4xf32> -> vector<8x8xf32>
    %93 = vector.broadcast %88 : vector<1x8xf32> to vector<8x8xf32>
    %94 = arith.mulf %85, %93 : vector<8x8xf32>
    %95 = vector.broadcast %89 : vector<1x8xf32> to vector<8x8xf32>
    %96 = arith.mulf %92, %95 : vector<8x8xf32>
    %97 = arith.addf %94, %96 : vector<8x8xf32>
    %cst_27 = arith.constant 0.353553385 : f32
    %98 = vector.broadcast %cst_27 : f32 to vector<8x8xf32>
    %99 = arith.mulf %97, %98 : vector<8x8xf32>
    %100 = vector.extract_strided_slice %86 {offsets = [0, 4], sizes = [8, 4], strides = [1, 1]} : vector<8x8xf32> to vector<8x4xf32>
    %101 = vector.extract_strided_slice %86 {offsets = [0, 0], sizes = [8, 4], strides = [1, 1]} : vector<8x8xf32> to vector<8x4xf32>
    %102 = tpu.concatenate %100, %101 in 1 : vector<8x4xf32>, vector<8x4xf32> -> vector<8x8xf32>
    %103 = vector.broadcast %88 : vector<1x8xf32> to vector<8x8xf32>
    %104 = arith.mulf %86, %103 : vector<8x8xf32>
    %105 = vector.broadcast %89 : vector<1x8xf32> to vector<8x8xf32>
    %106 = arith.mulf %102, %105 : vector<8x8xf32>
    %107 = arith.addf %104, %106 : vector<8x8xf32>
    %108 = tpu.transpose %107, [1, 0] : vector<8x8xf32> -> vector<8x8xf32>
    %cst_28 = arith.constant dense<0.000000e+00> : vector<8x8xf32>
    %109 = tpu.matmul %99, %108, %cst_28 {dimension_numbers = #tpu.dot_dimension_numbers<[1], [0], [0], [1], [0, 0, 1, 1], [], []>} : vector<8x8xf32>, vector<8x8xf32>, vector<8x8xf32> -> vector<8x8xf32>
    %cst_29 = arith.constant 0xFF800000 : f32
    %110 = vector.broadcast %cst_29 : f32 to vector<8x8xf32>
    %111 = arith.select %8, %109, %110 : vector<8x8xi1>, vector<8x8xf32>
    %cst_30 = arith.constant dense<0xFF800000> : vector<8xf32>
    %112 = vector.multi_reduction <maximumf>, %111, %cst_30 [1] : vector<8x8xf32> to vector<8xf32>
    %113 = vector.shape_cast %112 : vector<8xf32> to vector<8x1xf32>
    %114 = vector.broadcast %113 : vector<8x1xf32> to vector<8x8xf32>
    %115 = arith.subf %111, %114 : vector<8x8xf32>
    %116 = math.exp %115 : vector<8x8xf32>
    %cst_31 = arith.constant dense<0.000000e+00> : vector<8xf32>
    %117 = vector.multi_reduction <add>, %116, %cst_31 [1] : vector<8x8xf32> to vector<8xf32>
    %118 = vector.shape_cast %117 : vector<8xf32> to vector<8x1xf32>
    %119 = tpu.reciprocal %118 {approx = true} : vector<8x1xf32> -> vector<8x1xf32>
    %cst_32 = arith.constant dense<0.000000e+00> : vector<8x8xf32>
    %120 = tpu.matmul %116, %87, %cst_32 {dimension_numbers = #tpu.dot_dimension_numbers<[1], [0], [0], [1], [0, 0, 1, 1], [], []>} : vector<8x8xf32>, vector<8x8xf32>, vector<8x8xf32> -> vector<8x8xf32>
    %121 = vector.broadcast %119 : vector<8x1xf32> to vector<8x8xf32>
    %122 = arith.mulf %120, %121 : vector<8x8xf32>
    %123 = vector.extract_strided_slice %5 {offsets = [0, 24], sizes = [8, 8], strides = [1, 1]} : vector<8x96xf32> to vector<8x8xf32>
    %124 = vector.extract_strided_slice %5 {offsets = [0, 56], sizes = [8, 8], strides = [1, 1]} : vector<8x96xf32> to vector<8x8xf32>
    %125 = vector.extract_strided_slice %5 {offsets = [0, 88], sizes = [8, 8], strides = [1, 1]} : vector<8x96xf32> to vector<8x8xf32>
    %c3 = arith.constant 3 : index
    %c0_33 = arith.constant 0 : index
    %126 = vector.load %arg6[%c3, %c0_33] : memref<4x8xf32, #tpu.memory_space<vmem>>, vector<1x8xf32>
    %c3_34 = arith.constant 3 : index
    %c0_35 = arith.constant 0 : index
    %127 = vector.load %arg7[%c3_34, %c0_35] : memref<4x8xf32, #tpu.memory_space<vmem>>, vector<1x8xf32>
    %128 = vector.extract_strided_slice %123 {offsets = [0, 4], sizes = [8, 4], strides = [1, 1]} : vector<8x8xf32> to vector<8x4xf32>
    %129 = vector.extract_strided_slice %123 {offsets = [0, 0], sizes = [8, 4], strides = [1, 1]} : vector<8x8xf32> to vector<8x4xf32>
    %130 = tpu.concatenate %128, %129 in 1 : vector<8x4xf32>, vector<8x4xf32> -> vector<8x8xf32>
    %131 = vector.broadcast %126 : vector<1x8xf32> to vector<8x8xf32>
    %132 = arith.mulf %123, %131 : vector<8x8xf32>
    %133 = vector.broadcast %127 : vector<1x8xf32> to vector<8x8xf32>
    %134 = arith.mulf %130, %133 : vector<8x8xf32>
    %135 = arith.addf %132, %134 : vector<8x8xf32>
    %cst_36 = arith.constant 0.353553385 : f32
    %136 = vector.broadcast %cst_36 : f32 to vector<8x8xf32>
    %137 = arith.mulf %135, %136 : vector<8x8xf32>
    %138 = vector.extract_strided_slice %124 {offsets = [0, 4], sizes = [8, 4], strides = [1, 1]} : vector<8x8xf32> to vector<8x4xf32>
    %139 = vector.extract_strided_slice %124 {offsets = [0, 0], sizes = [8, 4], strides = [1, 1]} : vector<8x8xf32> to vector<8x4xf32>
    %140 = tpu.concatenate %138, %139 in 1 : vector<8x4xf32>, vector<8x4xf32> -> vector<8x8xf32>
    %141 = vector.broadcast %126 : vector<1x8xf32> to vector<8x8xf32>
    %142 = arith.mulf %124, %141 : vector<8x8xf32>
    %143 = vector.broadcast %127 : vector<1x8xf32> to vector<8x8xf32>
    %144 = arith.mulf %140, %143 : vector<8x8xf32>
    %145 = arith.addf %142, %144 : vector<8x8xf32>
    %146 = tpu.transpose %145, [1, 0] : vector<8x8xf32> -> vector<8x8xf32>
    %cst_37 = arith.constant dense<0.000000e+00> : vector<8x8xf32>
    %147 = tpu.matmul %137, %146, %cst_37 {dimension_numbers = #tpu.dot_dimension_numbers<[1], [0], [0], [1], [0, 0, 1, 1], [], []>} : vector<8x8xf32>, vector<8x8xf32>, vector<8x8xf32> -> vector<8x8xf32>
    %cst_38 = arith.constant 0xFF800000 : f32
    %148 = vector.broadcast %cst_38 : f32 to vector<8x8xf32>
    %149 = arith.select %8, %147, %148 : vector<8x8xi1>, vector<8x8xf32>
    %cst_39 = arith.constant dense<0xFF800000> : vector<8xf32>
    %150 = vector.multi_reduction <maximumf>, %149, %cst_39 [1] : vector<8x8xf32> to vector<8xf32>
    %151 = vector.shape_cast %150 : vector<8xf32> to vector<8x1xf32>
    %152 = vector.broadcast %151 : vector<8x1xf32> to vector<8x8xf32>
    %153 = arith.subf %149, %152 : vector<8x8xf32>
    %154 = math.exp %153 : vector<8x8xf32>
    %cst_40 = arith.constant dense<0.000000e+00> : vector<8xf32>
    %155 = vector.multi_reduction <add>, %154, %cst_40 [1] : vector<8x8xf32> to vector<8xf32>
    %156 = vector.shape_cast %155 : vector<8xf32> to vector<8x1xf32>
    %157 = tpu.reciprocal %156 {approx = true} : vector<8x1xf32> -> vector<8x1xf32>
    %cst_41 = arith.constant dense<0.000000e+00> : vector<8x8xf32>
    %158 = tpu.matmul %154, %125, %cst_41 {dimension_numbers = #tpu.dot_dimension_numbers<[1], [0], [0], [1], [0, 0, 1, 1], [], []>} : vector<8x8xf32>, vector<8x8xf32>, vector<8x8xf32> -> vector<8x8xf32>
    %159 = vector.broadcast %157 : vector<8x1xf32> to vector<8x8xf32>
    %160 = arith.mulf %158, %159 : vector<8x8xf32>
    %161 = tpu.concatenate %46, %84, %122, %160 in 1 : vector<8x8xf32>, vector<8x8xf32>, vector<8x8xf32>, vector<8x8xf32> -> vector<8x32xf32>
    %c0_42 = arith.constant 0 : index
    %c0_43 = arith.constant 0 : index
    %162 = vector.load %arg4[%c0_42, %c0_43] : memref<32x32xf32, #tpu.memory_space<vmem>>, vector<32x32xf32>
    %cst_44 = arith.constant dense<0.000000e+00> : vector<8x32xf32>
    %163 = tpu.matmul %161, %162, %cst_44 {dimension_numbers = #tpu.dot_dimension_numbers<[1], [0], [0], [1], [0, 0, 1, 1], [], []>} : vector<8x32xf32>, vector<32x32xf32>, vector<8x32xf32> -> vector<8x32xf32>
    %c0_45 = arith.constant 0 : index
    %c0_46 = arith.constant 0 : index
    %164 = vector.load %arg5[%c0_45, %c0_46] : memref<1x32xf32, #tpu.memory_space<vmem>>, vector<1x32xf32>
    %165 = vector.broadcast %164 : vector<1x32xf32> to vector<8x32xf32>
    %166 = arith.addf %163, %165 : vector<8x32xf32>
    %c0_47 = arith.constant 0 : index
    %c0_48 = arith.constant 0 : index
    %167 = vector.load %arg8[%c0_47, %c0_48] : memref<8x32xf32, #tpu.memory_space<vmem>>, vector<8x32xf32>
    tpu.vector_store %arg8[%c0_47, %c0_48], %166 {strides = array<i32>} : memref<8x32xf32, #tpu.memory_space<vmem>>, vector<8x32xf32>,
    return
  }
  func.func @transform_0(%arg0: i32) -> (i32, i32) {
    %c0_i32 = arith.constant 0 : i32
    %c0_i32_0 = arith.constant 0 : i32
    return %arg0, %c0_i32 : i32, i32
  }
  func.func @transform_1(%arg0: i32) -> (i32, i32) {
    %c0_i32 = arith.constant 0 : i32
    %c0_i32_0 = arith.constant 0 : i32
    %c0_i32_1 = arith.constant 0 : i32
    return %c0_i32, %c0_i32_0 : i32, i32
  }
  func.func @transform_2(%arg0: i32) -> (i32, i32) {
    %c0_i32 = arith.constant 0 : i32
    %c0_i32_0 = arith.constant 0 : i32
    %c0_i32_1 = arith.constant 0 : i32
    return %c0_i32, %c0_i32_0 : i32, i32
  }
  func.func @transform_3(%arg0: i32) -> (i32, i32) {
    %c0_i32 = arith.constant 0 : i32
    %c0_i32_0 = arith.constant 0 : i32
    %c0_i32_1 = arith.constant 0 : i32
    return %c0_i32, %c0_i32_0 : i32, i32
  }
  func.func @transform_4(%arg0: i32) -> (i32, i32) {
    %c0_i32 = arith.constant 0 : i32
    %c0_i32_0 = arith.constant 0 : i32
    %c0_i32_1 = arith.constant 0 : i32
    return %c0_i32, %c0_i32_0 : i32, i32
  }
  func.func @transform_5(%arg0: i32) -> (i32, i32) {
    %c0_i32 = arith.constant 0 : i32
    %c0_i32_0 = arith.constant 0 : i32
    %c0_i32_1 = arith.constant 0 : i32
    return %c0_i32, %c0_i32_0 : i32, i32
  }
  func.func @transform_6(%arg0: i32) -> (i32, i32) {
    %c0_i32 = arith.constant 0 : i32
    %c0_i32_0 = arith.constant 0 : i32
    %c0_i32_1 = arith.constant 0 : i32
    return %c0_i32, %c0_i32_0 : i32, i32
  }
  func.func @transform_7(%arg0: i32) -> (i32, i32) {
    %c0_i32 = arith.constant 0 : i32
    %c0_i32_0 = arith.constant 0 : i32
    return %arg0, %c0_i32 : i32, i32
  }
}

</mosaic_0001>

<bundles_post_ra>
// kernel: tpu_custom_call.1
= control target key start
LH: loop header
LB: loop body
LE: loop exit
PB: predicated region body
PF: predicated region fallthrough
CT: control target
= control target key end

     0   :  { %s1788_s0 = inlined_call_operand.hbm [shape: f32[16,32], index: 0, kind: input, shape index: {}]   ;;  %s1789_s1 = inlined_call_operand.hbm [shape: f32[32,96], index: 1, kind: input, shape index: {}]   ;;  %s1790_s2 = inlined_call_operand.hbm [shape: f32[1,96], index: 2, kind: input, shape index: {}]   ;;  %s1791_s3 = inlined_call_operand.hbm [shape: f32[32,32], index: 3, kind: input, shape index: {}]   ;;  %s1792_s4 = inlined_call_operand.hbm [shape: f32[1,32], index: 4, kind: input, shape index: {}]   ;;  %s1793_s5 = inlined_call_operand.vmem [shape: f32[4,8], index: 5, kind: input, shape index: {}]   ;;  %s1794_s6 = inlined_call_operand.hbm [shape: f32[4,8], index: 6, kind: input, shape index: {}]   ;;  %s1795_s7 = inlined_call_operand.hbm [shape: f32[16,32], index: 7, kind: output, shape index: {}]  }
   0x1   :  { %1796 = sst [smem:[#allocation19_spill]] %s1789_s1 }
   0x2   :  { %12 = vsyncpa [#allocation3], 0 }
   0x3   :  { %14 = vsyncpa [#allocation3 + $0x1], 0 }
   0x4   :  { %15 = vsyncpa [#allocation6], 0 }
   0x5   :  { %16 = vsyncpa [#allocation9], 0 }
   0x6   :  { %17 = vsyncpa [#allocation12], 0 }
   0x7   :  { %18 = vsyncpa [#allocation4], 0 }
   0x8   :  { %20 = vsyncpa [#allocation4 + $0x1], 0  ;;  %s1515_s24 = smov 0   ;;  %s1517_s25 = smov 0  }
   0x9   :  { %s1519_s26 = smov 0   ;;  %s1521_s27 = smov 0  }
   0xa LB: > { %s1797_s1 = sld [smem:[#allocation19_spill]]  ;;  %s1539_s8 = sadd.s32 4294967295, %s1442_s27   ;;  %s1442_s27 = sphi %s1521_s27, %s1808_s27   ;;  %s1438_s26 = sphi %s1519_s26, %s1807_s26   ;;  %s1434_s25 = sphi %s1517_s25, %s1806_s25   ;;  %s1430_s24 = sphi %s1515_s24, %s1805_s24  }
   0xb   : > { %p1000_p0 = scmp.ge.s32.totalorder %s1442_s27, 1  ;;  %p47_p1 = scmp.eq.s32.totalorder %s1539_s8, 0 }
   0xc   : > { %p209_p2 = scmp.lt.s32.totalorder %s1442_s27, 3  ;;  %s1444_s10 = smov [#allocation5]  }
   0xd   : > { %s222_s11 = sshll.u32 %s1444_s10, 4  ;;  %s246_s14 = sshll.u32 %s1791_s3, 4  ;;  %s223_s11 = int_to_ptr.vmem [resolvable:$true] %s222_s11  ;;  %s247_s14 = int_to_ptr.hbm [resolvable:$true] %s246_s14 }
   0xe   : > { %p1544_p3 = pnand %p1000_p0, %p209_p2  ;;  %s235_s18 = sshll.u32 %s1790_s2, 4  ;;  %s236_s18 = int_to_ptr.hbm [resolvable:$true] %s235_s18 }
   0xf   : > { %s1445_s19 = smov [#allocation8]   ;;  %s1446_s21 = smov 128  }
  0x10   : > { %s220_s30 = sshll.u32 %s1797_s1, 4  ;;  %p1059_p4 = pneg %p1544_p3  ;;  %s221_s30 = int_to_ptr.hbm [resolvable:$true] %s220_s30 }
  0x11   : > { %s248_s20 = sshll.u32 %s1445_s19, 4  ;;  %s1447_s22 = smov 8   ;;  %s249_s20 = int_to_ptr.vmem [resolvable:$true] %s248_s20 }
  0x12   : > { %p1556_p6 = pnand %p1059_p4, %p47_p1  ;;  %s261_s29 = sshll.u32 %s1792_s4, 4  ;;  %s262_s29 = int_to_ptr.hbm [resolvable:$true] %s261_s29 }
  0x13   : > { %s1448_s10 = smov [#allocation7]   ;;  %s276_s16 = sshll.u32 %s1794_s6, 4  ;;  %s277_s16 = int_to_ptr.hbm [resolvable:$true] %s276_s16 }
  0x14   : > { %1062 = dma.hbm_to_vmem [thread:$0]  (!%p1556_p6), %s221_s30, 512, %s223_s11, [#allocation6], %s1446_s21, %s1446_s21, %s1447_s22  }
  0x15   : > { %1068 = dma.hbm_to_vmem [thread:$0]  (!%p1556_p6), %s247_s14, 512, %s249_s20, [#allocation9], %s1446_s21, %s1446_s21, %s1447_s22  }
  0x16   : > { %s237_s12 = sshll.u32 %s1448_s10, 4  ;;  %s1449_s30 = smov [#allocation10]   ;;  %s238_s12 = int_to_ptr.vmem [resolvable:$true] %s237_s12 }
  0x17   : > { %1065 = dma.hbm_to_vmem [thread:$0]  (!%p1556_p6), %s236_s18, 16, %s238_s12, [#allocation6]  }
  0x18   : > { %s263_s11 = sshll.u32 %s1449_s30, 4  ;;  %s1450_s17 = smov [#allocation11]   ;;  %s264_s11 = int_to_ptr.vmem [resolvable:$true] %s263_s11 }
  0x19   : > { %1071 = dma.hbm_to_vmem [thread:$0]  (!%p1556_p6), %s262_s29, 16, %s264_s11, [#allocation9]  }
  0x1a   : > { %s278_s19 = sshll.u32 %s1450_s17, 4  ;;  %s999_s18 = sadd.s32 4294967294, %s1442_s27   ;;  %s279_s19 = int_to_ptr.vmem [resolvable:$true] %s278_s19 }
  0x1b   : > { %1074 = dma.hbm_to_vmem [thread:$0]  (!%p1556_p6), %s277_s16, 64, %s279_s19, [#allocation12]  }
  0x1c   : > { %s1581_s20 = sadd.s32 1, %s1442_s27   ;;  %s33_s21 = sadd.s32 1, %s1438_s26 }
  0x1d   : > { %s30_s22 = ssub.s32 %s1442_s27, %s1581_s20  ;;  %p40_p7 = scmp.ne.s32.totalorder %s1438_s26, %s1434_s25 }
  0x1e   : > { %p31_p8 = scmp.eq.s32.totalorder %s30_s22, 0  ;;  %p41_p9 = scmp.eq.s32.totalorder %s1442_s27, 0 }
  0x1f   : > { %p46_p10 = scmp.ne.s32.totalorder %s1434_s25, %s1430_s24  ;;  %p196_p11 = scmp.eq.s32.totalorder %s1539_s8, 1 }
  0x20   : > { %s1593_s23 = scalar_select %p31_p8, %s1438_s26, %s33_s21  }
  0x21   : > { %p1597_p12 = por %p47_p1, %p46_p10  ;;  %p1601_p13 = por %p196_p11, %p40_p7 }
  0x22   : > { %p202_p0 = scmp.eq.s32.totalorder %s999_s18, 1  ;;  %p42_p2 = por %p41_p9, %p40_p7 }
  0x23   : > { %s289_s29 = sand.u32 1, %s1438_s26   ;;  %p1088_p6 = scmp.lt.s32.totalorder %s1442_s27, 2 }
  0x24   : > { %p1606_p4 = por %p202_p0, %p46_p10  ;;  %s1007_s12 = sshll.u32 %s289_s29, 3 }
  0x25   : > { %s1008_s30 = sshll.u32 %s1442_s27, 3  ;;  %s293_s17 = scalar_lea.vmem [#allocation2], %s1007_s12 }
  0x26   : > { %s297_s14 = scalar_lea.hbm %s1788_s0, %s1008_s30  ;;  %s301_s19 = sshll.u32 %s293_s17, 4  ;;  %s302_s19 = int_to_ptr.vmem [resolvable:$true] %s301_s19 }
  0x27   : > { %s299_s16 = sshll.u32 %s297_s14, 4  ;;  %p1615_p8 = pnand %p1088_p6, %p42_p2  ;;  %s300_s16 = int_to_ptr.hbm [resolvable:$true] %s299_s16 }
  0x28   : > { %s290_s21 = scalar_lea.sflag [#allocation3], %s289_s29  ;;  %s1334_s22 = sshra.s32 %s300_s16, 4  ;;  %s1335_s22 = int_to_ptr.hbm [resolvable:$true] %s1334_s22 }
  0x29   : > { %s1336_s1 = scalar_lea.hbm %s1335_s22, 8  ;;  %p1338_p9 = pneg %p1615_p8 }
  0x2a   : > { %p1337_p7 = scmp.ne.s32.totalorder %s1335_s22, %s1336_s1  ;;  %s1341_s12 = scalar_lea.hbm %s1788_s0, 16 }
  0x2b   : > { %p1342_p0 = scmp.lt.s32.totalorder %s1335_s22, %s1788_s0  ;;  %p1343_p2 = scmp.lt.s32.totalorder %s1341_s12, %s1336_s1 }
  0x2c   : > { %p1339_p10 = pnand %p1338_p9, %p1337_p7 }
  0x2d   : > { %p1344_p6 = por %p1343_p2, %p1342_p0 }
  0x2e   : > { %p1340_p11 = pneg %p1339_p10 }
  0x30   : > { %p1345_p5 = pnand %p1344_p6, %p1340_p11 }
  0x32   : > { %1348 = shalt.err (!%p1345_p5)
}
  0x33   : > { %1078 = dma.hbm_to_vmem [thread:$0]  (!%p1615_p8), %s300_s16, 128, %s302_s19, %s290_s21  }
  0x34   : > { %310 = sbr.rel (%p1544_p3) target bundleno = 1234 (0x4d2), region = 48  ;;  %s1632_s29 = sand.u32 (!%p1544_p3), 1, %s1434_s25  }
  0x35   : > { %s1010_s17 = sshll.u32 (!%p1544_p3), %s1632_s29, 3  ;;  %s313_s30 = scalar_lea.sflag (!%p1544_p3), [#allocation3], %s1632_s29 }
  0x36   : > { %s316_s1 = scalar_lea.vmem (!%p1544_p3), [#allocation2], %s1010_s17 }
  0x39   : > { %1409 = dma.done.wait (%p1597_p12), %s313_s30, 128  }
  0x3a   : > { %1411 = vsyncadd (%p1597_p12), %s313_s30, 4294967168 }
  0x3b   : > { %1413 = dma.done.wait (%p47_p1), [#allocation6], 528  }
  0x3c   : > { %1415 = vsyncadd (%p47_p1), [#allocation6], 4294966768 }
  0x3d   : > { %1417 = dma.done.wait (%p47_p1), [#allocation9], 528  }
  0x3e   : > { %1419 = vsyncadd (%p47_p1), [#allocation9], 4294966768 }
  0x3f   : > { %1421 = dma.done.wait (%p47_p1), [#allocation12], 64  }
  0x40   : > { %1423 = vsyncadd (%p47_p1), [#allocation12], 4294967232  ;;  %v377_v0 = vld [vmem:[#allocation5 + $0x18] sm:$0xff]  ;;  %v376_v1 = vld [vmem:[#allocation5 + $0x10] sm:$0xff]  ;;  %vm382_vm0 = vcmask 261120   ;;  %s1451_s9 = smov 116  }
  0x41   : > { %398 = vmatpush.msra.mxu0 %v377_v0  ;;  %v375_v2 = vld [vmem:[#allocation5 + $0x8] sm:$0xff]  ;;  %v374_v3 = vld [vmem:[#allocation5] sm:$0xff]  ;;  %v373_v4 = vld [vmem:[%s316_s1] sm:$0xff]  ;;  %s1452_s15 = smov 84   ;;  %s1453_s16 = smov 92   ;;  %vm420_vm1 = vcmask 31744  }
  0x42   : > { %v1158_v5 = vld [vmem:[#allocation7] ss:$0 sm:$0xff]  ;;  %s1454_s19 = smov 76   ;;  %s1455_s18 = smov 124   ;;  %v1666_v8 = vld [vmem:[%s1793_s5] ss:$0 sm:$0xff] }
  0x43   : > { %399 = vmatpush.msra.mxu0 %v376_v1  ;;  %s1456_s21 = smov 100   ;;  %s1457_s12 = smov 32   ;;  %v1160_v9 = vld [vmem:[%s1793_s5 + $0x1] ss:$0 sm:$0xff]  ;;  %v1161_v10 = vld [vmem:[%s1793_s5 + $0x2] ss:$0 sm:$0xff] }
  0x44   : > { %s1458_s13 = smov 68   ;;  %s1459_s14 = smov 108   ;;  %v1162_v12 = vld [vmem:[#allocation11 + $0x2] ss:$0 sm:$0xff]  ;;  %v1684_v18 = vld [vmem:[#allocation11] ss:$0 sm:$0xff] }
  0x45   : > { %400 = vmatpush.msra.mxu0 %v375_v2  ;;  %v1163_v19 = vld [vmem:[#allocation11 + $0x1] ss:$0 sm:$0xff]  ;;  %v1165_v26 = vld [vmem:[#allocation11 + $0x3] ss:$0 sm:$0xff]  ;;  %v1166_v29 = vld [vmem:[%s1793_s5 + $0x3] ss:$0 sm:$0xff] }
  0x46   : > { %s1467_s30 = smov 96   ;;  %s1468_s1 = smov 120   ;;  %vm449_vm2 = vcmask 64512   ;;  %vm829_vm4 = vcmask 130048   ;;  %vm831_vm5 = vcmask 195584  }
  0x47   : > { %401 = vmatpush.msra.mxu0 %v374_v3  ;;  %s1471_s22 = smov 72   ;;  %s1472_s11 = smov 112  }
  0x48   : > { %1017 = vmatmul.msk.f32.vlgmr.msra.gmra.mxu0 %vm382_vm0, %v373_v4 }
  0xc5   : > { %v403_v6 = vpop.f32.mrf.mxu0 }
  0xc6   : > { %v1655_v7 = vadd.f32 %v1158_v5, %v403_v6 }
  0xc8   : > { %515 = vrot.lane.b32.xlu2 %v1655_v7, %s1451_s9  ;;  %533 = vrot.lane.b32.xlu1 %v1655_v7, %s1452_s15  ;;  %s1469_s9 = smov 80   ;;  %s1470_s15 = smov 88  }
  0xc9   : > { %428 = vrot.lane.b32.xlu0 %v1655_v7, %s1453_s16  ;;  %s1460_s16 = smov 8  }
  0xd0   : > { %635 = vrot.lane.b32.xlu2 %v1655_v7, %s1454_s19  ;;  %414 = vrot.lane.b32.xlu1 %v1655_v7, %s1455_s18  ;;  %s1461_s19 = smov 40   ;;  %s1462_s18 = smov 16  }
  0xd1   : > { %431 = vrot.lane.b32.xlu0 %v1655_v7, %s1456_s21  ;;  %s1463_s21 = smov 48  }
  0xd8   : > { %436 = vrot.lane.b32.xlu2 %v1666_v8, %s1457_s12  ;;  %734 = vrot.lane.b32.xlu1 %v1655_v7, %s1458_s13  ;;  %s1464_s13 = smov 56  }
  0xd9   : > { %617 = vrot.lane.b32.xlu0 %v1655_v7, %s1459_s14  ;;  %s1466_s14 = smov 4  }
  0xe0   : > { %521 = vrot.lane.b32.xlu2 %v1160_v9, %s1460_s16  ;;  %537 = vrot.lane.b32.xlu1 %v1160_v9, %s1461_s19 }
  0xe1   : > { %623 = vrot.lane.b32.xlu0 %v1161_v10, %s1462_s18 }
  0xe8   : > { %639 = vrot.lane.b32.xlu2 %v1161_v10, %s1463_s21  ;;  %v423_v10 = vmul.f32 %v1666_v8, %v1655_v7 }
 0x122   : > { %v516_v11 = vpop.permute.xlu2 %515 }
 0x12a   : > { %v636_v13 = vpop.permute.xlu2 %635 }
 0x132   : > { %v437_v38 = vpop.permute.xlu2 %436 }
 0x133   : > { %v439_v44 = vmul.f32 %v437_v38, %v1655_v7 }
 0x13a   : > { %v534_v14 = vpop.permute.xlu1 %533  ;;  %v522_v39 = vpop.permute.xlu2 %521 }
 0x13b   : > { %v638_v15 = vsel %vm420_vm1, %v636_v13, %v534_v14  ;;  %v429_v16 = vpop.permute.xlu0 %428  ;;  %v524_v42 = vmul.f32 %v522_v39, %v1655_v7 }
 0x13c   : > { %v643_v17 = vmul.f32 %v1162_v12, %v638_v15  ;;  %v536_v27 = vsel %vm420_vm1, %v534_v14, %v429_v16 }
 0x13d   : > { %v541_v32 = vmul.f32 %v1163_v19, %v536_v27 }
 0x13e   : > { %645 = vrot.lane.b32.xlu2 %v643_v17, %s1463_s21 }
 0x142   : > { %v1686_v20 = vpop.permute.xlu1 %414  ;;  %v640_v43 = vpop.permute.xlu2 %639 }
 0x143   : > { %v518_v21 = vsel %vm420_vm1, %v516_v11, %v1686_v20  ;;  %v432_v22 = vpop.permute.xlu0 %431  ;;  %v642_v51 = vmul.f32 %v640_v43, %v1655_v7 }
 0x144   : > { %v526_v23 = vmul.f32 %v1163_v19, %v518_v21  ;;  %v434_v24 = vsel %vm420_vm1, %v429_v16, %v432_v22 }
 0x145   : > { %v440_v25 = vmul.f32 %v1684_v18, %v434_v24 }
 0x146   : > { %528 = vrot.lane.b32.xlu1 %v526_v23, %s1460_s16 }
 0x147   : > { %442 = vrot.lane.b32.xlu0 %v440_v25, %s1457_s12  ;;  %s1465_s12 = smov 24  }
 0x14a   : > { %v735_v28 = vpop.permute.xlu1 %734 }
 0x14b   : > { %v737_v30 = vsel %vm420_vm1, %v735_v28, %v636_v13  ;;  %v618_v33 = vpop.permute.xlu0 %617 }
 0x14c   : > { %v742_v31 = vmul.f32 %v1165_v26, %v737_v30  ;;  %v620_v34 = vsel %vm420_vm1, %v618_v33, %v516_v11  ;;  %v719_v36 = vsel %vm420_vm1, %v432_v22, %v618_v33 }
 0x14d   : > { %v628_v35 = vmul.f32 %v1162_v12, %v620_v34  ;;  %v727_v37 = vmul.f32 %v1165_v26, %v719_v36 }
 0x14e   : > { %738 = vrot.lane.b32.xlu1 %v1166_v29, %s1464_s13  ;;  %744 = vrot.lane.b32.xlu2 %v742_v31, %s1464_s13 }
 0x14f   : > { %543 = vrot.lane.b32.xlu0 %v541_v32, %s1461_s19 }
 0x152   : > { %v538_v40 = vpop.permute.xlu1 %537 }
 0x153   : > { %v624_v41 = vpop.permute.xlu0 %623  ;;  %v540_v52 = vmul.f32 %v538_v40, %v1655_v7 }
 0x154   : > { %v626_v58 = vmul.f32 %v624_v41, %v1655_v7 }
 0x156   : > { %630 = vrot.lane.b32.xlu1 %v628_v35, %s1462_s18 }
 0x157   : > { %722 = vrot.lane.b32.xlu0 %v1166_v29, %s1465_s12 }
 0x15e   : > { %417 = vrot.lane.b32.xlu1 %v1655_v7, %s1466_s14  ;;  %s1473_s14 = smov 104  }
 0x15f   : > { %729 = vrot.lane.b32.xlu0 %v727_v37, %s1465_s12 }
 0x198   : > { %v646_v50 = vpop.permute.xlu2 %645 }
 0x199   : > { %v648_v55 = vadd.f32 %v646_v50, %v642_v51 }
 0x1a8   : > { %v745_v60 = vpop.permute.xlu2 %744 }
 0x1b8   : > { %v529_v45 = vpop.permute.xlu1 %528 }
 0x1b9   : > { %v531_v46 = vadd.f32 %v529_v45, %v524_v42  ;;  %v443_v47 = vpop.permute.xlu0 %442 }
 0x1ba   : > { %v445_v48 = vadd.f32 %v443_v47, %v439_v44 }
 0x1bb   : > { %v532_v49 = vmul.f32 0.35355338, %v531_v46 }
 0x1bc   : > { %447 = vrot.lane.b32.xlu2 %v445_v48, %s1467_s30  ;;  %s1474_s30 = smov 64  }
 0x1bd   : > { %548 = vrot.lane.b32.xlu1 %v532_v49, %s1468_s1 }
 0x1c0   : > { %v739_v53 = vpop.permute.xlu1 %738 }
 0x1c1   : > { %v544_v54 = vpop.permute.xlu0 %543  ;;  %v741_v57 = vmul.f32 %v739_v53, %v1655_v7 }
 0x1c2   : > { %v546_v56 = vadd.f32 %v544_v54, %v540_v52 }
 0x1c3   : > { %v747_v63 = vadd.f32 %v745_v60, %v741_v57 }
 0x1c4   : > { %653 = vrot.lane.b32.xlu2 %v648_v55, %s1469_s9  ;;  %551 = vrot.lane.b32.xlu0 %v546_v56, %s1470_s15  ;;  %s866_s9 = scalar_lea.sflag [#allocation4], %s1632_s29 }
 0x1c8   : > { %v631_v59 = vpop.permute.xlu1 %630 }
 0x1c9   : > { %v633_v61 = vadd.f32 %v631_v59, %v626_v58  ;;  %v723_v62 = vpop.permute.xlu0 %722 }
 0x1ca   : > { %v725_v1 = vmul.f32 %v723_v62, %v1655_v7 }
 0x1cb   : > { %v634_v0 = vmul.f32 0.35355338, %v633_v61 }
 0x1cc   : > { %752 = vrot.lane.b32.xlu0 %v747_v63, %s1471_s22 }
 0x1cd   : > { %650 = vrot.lane.b32.xlu1 %v634_v0, %s1472_s11 }
 0x1d0   : > { %v418_v5 = vpop.permute.xlu1 %417 }
 0x1d1   : > { %v730_v2 = vpop.permute.xlu0 %729  ;;  %v421_v6 = vsel %vm420_vm1, %v1686_v20, %v418_v5  ;;  %v406_v20 = vlaneseq }
 0x1d2   : > { %v732_v3 = vadd.f32 %v730_v2, %v725_v1  ;;  %v425_v9 = vmul.f32 %v1684_v18, %v421_v6  ;;  %v836_v6 = vld [vmem:[#allocation8 + $0x18] sm:$0xff] }
 0x1d3   : > { %v407_v21 = vshrl.u32 %v406_v20, 7  ;;  %v409_v22 = vand.u32 127, %v406_v20  ;;  %v1167_v20 = vld [vmem:[#allocation10] ss:$0 sm:$0xff] }
 0x1d4   : > { %v733_v4 = vmul.f32 0.35355338, %v732_v3  ;;  %v426_v11 = vadd.f32 %v425_v9, %v423_v10  ;;  %v835_v9 = vld [vmem:[#allocation8 + $0x10] sm:$0xff]  ;;  %v834_v10 = vld [vmem:[#allocation8 + $0x8] sm:$0xff] }
 0x1d5   : > { %vm410_vm3 = vcmp.ge.s32.totalorder %v407_v21, %v409_v22 }
 0x1d6   : > { %749 = vrot.lane.b32.xlu2 %v733_v4, %s1473_s14  ;;  %v427_v13 = vmul.f32 0.35355338, %v426_v11  ;;  %v833_v11 = vld [vmem:[#allocation8] sm:$0xff] }
 0x1de   : > { %486 = vrot.lane.b32.xlu2 %v1655_v7, %s1474_s30 }
 0x216   : > { %v448_v12 = vpop.permute.xlu2 %447 }
 0x217   : > { %1018 = vmatpush.xpose.msk.msra.mxu1 %vm449_vm2, %v448_v12 }
 0x21a   : > { %1019 = vmatmul.msk.f32.vlgmr.msra.gmra.mxu1 %vm449_vm2, %v427_v13 }
 0x21e   : > { %v654_v14 = vpop.permute.xlu2 %653 }
 0x21f   : > { %1024 = vmatpush.xpose.msk.msrb.mxu1 %vm449_vm2, %v654_v14 }
 0x223   : > { %856 = vmatpush.msra.mxu1 %v836_v6 }
 0x225   : > { %857 = vmatpush.msra.mxu1 %v835_v9 }
 0x227   : > { %858 = vmatpush.msra.mxu1 %v834_v10 }
 0x229   : > { %859 = vmatpush.msra.mxu1 %v833_v11 }
 0x22f   : > { %v549_v17 = vpop.permute.xlu1 %548 }
 0x230   : > { %v750_v15 = vpop.permute.xlu2 %749 }
 0x236   : > { %v552_v16 = vpop.permute.xlu0 %551 }
 0x237   : > { %1021 = vmatpush.xpose.msk.msra.mxu3 %vm449_vm2, %v552_v16 }
 0x238   : > { %v487_v18 = vpop.permute.xlu2 %486 }
 0x239   : > { %507 = vmatpush.msra.mxu2 %v487_v18 }
 0x23a   : > { %1022 = vmatmul.msk.f32.vlgmr.msra.gmra.mxu3 %vm449_vm2, %v549_v17 }
 0x23e   : > { %v753_v8 = vpop.permute.xlu0 %752 }
 0x23f   : > { %1027 = vmatpush.xpose.msk.msrb.mxu0 %vm449_vm2, %v753_v8  ;;  %v651_v19 = vpop.permute.xlu1 %650 }
 0x240   : > { %1025 = vmatmul.msk.f32.vlgmr.msrb.gmra.mxu1 %vm449_vm2, %v651_v19 }
 0x242   : > { %1028 = vmatmul.msk.f32.vlgmr.msrb.gmra.mxu0 %vm449_vm2, %v750_v15 }
 0x297   : > { %v472_v23 = vpop.f32.mrf.mxu1 }
 0x298   : > { %v475_v24 = vsel %vm410_vm3, %v472_v23, -inf }
 0x299   : > { %v476_v25 = vsel %vm449_vm2, %v475_v24, -inf }
 0x29a   : > { %477 = vmax.xlane.f32.xlu0 %v476_v25 }
 0x2bd   : > { %v574_v26 = vpop.f32.mrf.mxu3  ;;  %v676_v27 = vpop.f32.mrf.mxu1 }
 0x2be   : > { %v577_v28 = vsel %vm410_vm3, %v574_v26, -inf  ;;  %v679_v29 = vsel %vm410_vm3, %v676_v27, -inf }
 0x2bf   : > { %v775_v30 = vpop.f32.mrf.mxu0  ;;  %v578_v31 = vsel %vm449_vm2, %v577_v28, -inf  ;;  %v680_v32 = vsel %vm449_vm2, %v679_v29, -inf }
 0x2c0   : > { %v778_v33 = vsel %vm410_vm3, %v775_v30, -inf  ;;  %579 = vmax.xlane.f32.xlu1 %v578_v31  ;;  %681 = vmax.xlane.f32.xlu2 %v680_v32 }
 0x2c1   : > { %v779_v34 = vsel %vm449_vm2, %v778_v33, -inf }
 0x2c2   : > { %780 = vmax.xlane.f32.xlu0 %v779_v34 }
 0x2d6   : > { %789 = vrot.lane.b32.xlu0 %v1655_v7, %s1461_s19 }
 0x2d8   : > { %690 = vrot.lane.b32.xlu2 %v1655_v7, %s1463_s21 }
 0x2d9   : > { %588 = vrot.lane.b32.xlu1 %v1655_v7, %s1464_s13  ;;  %s372_s13 = scalar_lea.vmem [#allocation13], %s1010_s17  ;;  %s1384_s17 = scalar_lea.hbm %s1795_s7, 16 }
 0x30d   : > { %v478_v35 = vpop.xlane.xlu0 %477 }
 0x30e   : > { %v479_v36 = vsub.f32 %v475_v24, %v478_v35 }
 0x310   : > { %v480_v37 = vmul.f32 1.442695, %v479_v36 }
 0x312   : > { %1168 = vpow2.f32 %v480_v37 }
 0x318   : > { %v1169_v38 = vpop.eup %1168 }
 0x319   : > { %1020 = vmatmul.msk.f32.vlgmr.msra.gmra.mxu2 %vm449_vm2, %v1169_v38  ;;  %v482_v54 = vsel %vm449_vm2, %v1169_v38, 0.0 }
 0x333   : > { %v580_v39 = vpop.xlane.xlu1 %579  ;;  %v682_v40 = vpop.xlane.xlu2 %681 }
 0x334   : > { %v581_v41 = vsub.f32 %v577_v28, %v580_v39  ;;  %v683_v42 = vsub.f32 %v679_v29, %v682_v40 }
 0x335   : > { %v781_v43 = vpop.xlane.xlu0 %780 }
 0x336   : > { %v582_v44 = vmul.f32 1.442695, %v581_v41  ;;  %v684_v45 = vmul.f32 1.442695, %v683_v42  ;;  %v782_v46 = vsub.f32 %v778_v33, %v781_v43 }
 0x338   : > { %1170 = vpow2.f32 %v582_v44  ;;  %v783_v47 = vmul.f32 1.442695, %v782_v46 }
 0x339   : > { %1172 = vpow2.f32 %v684_v45 }
 0x33a   : > { %1174 = vpow2.f32 %v783_v47 }
 0x33b   : > { %v691_v7 = vpop.permute.xlu2 %690 }
 0x33c   : > { %711 = vmatpush.msrb.mxu3 %v691_v7 }
 0x33e   : > { %v1171_v48 = vpop.eup %1170 }
 0x33f   : > { %v1173_v49 = vpop.eup %1172  ;;  %v584_v50 = vsel %vm449_vm2, %v1171_v48, 0.0 }
 0x340   : > { %v1175_v51 = vpop.eup %1174  ;;  %585 = vadd.xlane.f32.xlu1 %v584_v50  ;;  %1026 = vmatmul.msk.f32.vlgmr.msrb.gmra.mxu3 %vm449_vm2, %v1173_v49  ;;  %v686_v52 = vsel %vm449_vm2, %v1173_v49, 0.0 }
 0x341   : > { %687 = vadd.xlane.f32.xlu0 %v686_v52  ;;  %v785_v53 = vsel %vm449_vm2, %v1175_v51, 0.0 }
 0x342   : > { %786 = vadd.xlane.f32.xlu2 %v785_v53 }
 0x348   : > { %483 = vadd.xlane.f32.xlu1 %v482_v54  ;;  %v790_v56 = vpop.permute.xlu0 %789 }
 0x34b   : > { %v589_v55 = vpop.permute.xlu1 %588 }
 0x34c   : > { %609 = vmatpush.msrb.mxu2 %v589_v55 }
 0x34d   : > { %1023 = vmatmul.msk.f32.vlgmr.msrb.gmra.mxu2 %vm449_vm2, %v1171_v48 }
 0x34e   : > { %810 = vmatpush.msra.mxu2 %v790_v56 }
 0x355   : > { %1029 = vmatmul.msk.f32.vlgmr.msra.gmra.mxu2 %vm449_vm2, %v1175_v51 }
 0x39c   : > { %v509_v62 = vpop.f32.mrf.mxu2 }
 0x3b3   : > { %v586_v61 = vpop.xlane.xlu1 %585 }
 0x3b4   : > { %v688_v57 = vpop.xlane.xlu0 %687 }
 0x3b5   : > { %1176 = vrcp.f32 %v688_v57  ;;  %v787_v63 = vpop.xlane.xlu2 %786 }
 0x3b6   : > { %1178 = vrcp.f32 %v586_v61 }
 0x3b7   : > { %1180 = vrcp.f32 %v787_v63 }
 0x3bb   : > { %v1177_v58 = vpop.eup %1176  ;;  %v484_v12 = vpop.xlane.xlu1 %483 }
 0x3bc   : > { %v1179_v0 = vpop.eup %1178  ;;  %1182 = vrcp.f32 %v484_v12 }
 0x3bd   : > { %v1181_v3 = vpop.eup %1180 }
 0x3c2   : > { %v1183_v13 = vpop.eup %1182 }
 0x3c3   : > { %v713_v59 = vpop.f32.mrf.mxu3  ;;  %v512_v15 = vmul.f32 %v1183_v13, %v509_v62 }
 0x3c4   : > { %v716_v60 = vmul.f32 %v1177_v58, %v713_v59 }
 0x3c6   : > { %821 = vrot.lane.b32.xlu2 %v716_v60, %s1462_s18 }
 0x3d0   : > { %v611_v1 = vpop.f32.mrf.mxu2 }
 0x3d1   : > { %v614_v2 = vmul.f32 %v1179_v0, %v611_v1 }
 0x3d3   : > { %817 = vrot.lane.b32.xlu0 %v614_v2, %s1460_s16  ;;  %s1032_s16 = sshll.u32 %s1539_s8, 3 }
 0x3d4   : > { %s876_s21 = scalar_lea.hbm %s1795_s7, %s1032_s16 }
 0x3d5   : > { %s880_s1 = sshll.u32 %s876_s21, 4  ;;  %s881_s1 = int_to_ptr.hbm [resolvable:$true] %s880_s1 }
 0x3d6   : > { %s1378_s15 = sshra.s32 %s881_s1, 4  ;;  %s1379_s15 = int_to_ptr.hbm [resolvable:$true] %s1378_s15 }
 0x3d7   : > { %s1380_s8 = scalar_lea.hbm %s1379_s15, 8  ;;  %p1385_p12 = scmp.lt.s32.totalorder %s1379_s15, %s1795_s7 }
 0x3d8   : > { %v812_v4 = vpop.f32.mrf.mxu2  ;;  %p1381_p1 = scmp.ne.s32.totalorder %s1379_s15, %s1380_s8  ;;  %p1386_p8 = scmp.lt.s32.totalorder %s1384_s17, %s1380_s8 }
 0x3d9   : > { %v815_v5 = vmul.f32 %v1181_v3, %v812_v4 }
 0x3da   : > { %p1382_p3 = pnand %p1381_p1, %p1601_p13  ;;  %p1387_p7 = por %p1386_p8, %p1385_p12 }
 0x3db   : > { %825 = vrot.lane.b32.xlu1 %v815_v5, %s1465_s12  ;;  %s878_s12 = sshll.u32 %s372_s13, 4  ;;  %s879_s12 = int_to_ptr.vmem [resolvable:$true] %s878_s12 }
 0x3dc   : > { %p1383_p5 = pneg %p1382_p3 }
 0x3de   : > { %p1388_p9 = pnand %p1387_p7, %p1383_p5 }
 0x420   : > { %v822_v17 = vpop.permute.xlu2 %821 }
 0x445   : > { %v818_v14 = vpop.permute.xlu0 %817 }
 0x446   : > { %v828_v16 = vsel %vm449_vm2, %v512_v15, %v818_v14 }
 0x447   : > { %v830_v8 = vsel %vm829_vm4, %v828_v16, %v822_v17 }
 0x44d   : > { %v826_v18 = vpop.permute.xlu1 %825 }
 0x44e   : > { %v832_v19 = vsel %vm831_vm5, %v830_v8, %v826_v18 }
 0x44f   : > { %1030 = vmatmul.msk.f32.vlgmr.msra.gmra.mxu1 %vm382_vm0, %v832_v19 }
 0x4cc   : > { %v861_v21 = vpop.f32.mrf.mxu1 }
 0x4cd   : > { %v862_v22 = vadd.f32 %v1167_v20, %v861_v21 }
 0x4cf   : > { %864 = vst.msk [vmem:[%s372_s13] sm:$0xff] %vm382_vm0, %v862_v22 }
 0x4d0   : > { %1391 = shalt.err (!%p1388_p9)
}
 0x4d1   : > { %1057 = dma.vmem_to_hbm [thread:$0]  (%p1601_p13), %s879_s12, 128, %s881_s1, %s866_s9  }
 0x4d2 PF: > { %s892_s29 = sand.u32 1, %s1430_s24   ;;  %p1804_p10 = scmp.ge.s32.totalorder %s1442_s27, 2 }
 0x4d3   : > { %s893_s16 = scalar_lea.sflag [#allocation4], %s892_s29 }
 0x4d4   : > { %p1080_p11 = pnand %p1804_p10, %p1606_p4 }
 0x4d6   : > { %p1081_p0 = pneg %p1080_p11 }
 0x4d8   : > { %1425 = dma.done.wait (%p1081_p0), %s893_s16, 128  }
 0x4d9   : > { %1427 = vsyncadd (%p1081_p0), %s893_s16, 4294967168  ;;  %p23_p2 = scmp.ge.s32.totalorder %s1581_s20, 4   ;;  %s1805_s24 = smov %s1434_s25 }
 0x4da   : > { %s1806_s25 = smov %s1438_s26  ;;  %s1807_s26 = smov %s1593_s23 }
 0x4db   : > { %s1808_s27 = smov %s1581_s20  ;;  %25 = sbr.rel (!%p23_p2) target bundleno = 10 (0xa), region = 113 }
 0x4e0   :  { %899 = vsyncpa [#allocation3], 1 }
 0x4e1   :  { %901 = vsyncpa [#allocation3 + $0x1], 1 }
 0x4e2   :  { %902 = vsyncpa [#allocation6], 1 }
 0x4e3   :  { %903 = vsyncpa [#allocation9], 1 }
 0x4e4   :  { %904 = vsyncpa [#allocation12], 1 }
 0x4e5   :  { %905 = vsyncpa [#allocation4], 1 }
 0x4e6   :  { %907 = vsyncpa [#allocation4 + $0x1], 1 }

</bundles_post_ra>
